<compile_context>
chip_gen: v7x
topology: tpu7x:2x2x1
jax: 0.10.0
libtpu: 0.0.40
codegen_flags: <defaults>
</compile_context>

<pallas_src>
import functools

import jax
import jax.numpy as jnp
import numpy as np
from jax.experimental import pallas as pl
from jax.experimental.pallas import tpu as pltpu

# --------------------------------------------------------------------------------------
# Packed-slab layout (all segment starts are multiples of the 128-lane tile).
# Requires S, H, O, V <= 128 and H % 8 == 0 (true for this module config).
# --------------------------------------------------------------------------------------
_L = 128
_OFF_TOK = 0 * _L   # one_hot(tok) side : [tok->logits | tok->comb]            width 2*_L
_OFF_H   = 2 * _L   # hidden side       : [h->logits | h->r | h->z | h->n]     width 4*_L
_OFF_A   = 6 * _L   # attn_applied side : [attn_applied->comb]                 width 1*_L
_OFF_X   = 7 * _L   # GRU input side    : [x->r | x->z | x->n]                 width 3*_L
_OFF_FC  = 10 * _L  # final fc          : [h_new->pred]                        width 1*_L
_N_COLS  = 11 * _L  # = 1408

_W_TOK = 2 * _L
_W_H   = 4 * _L
_W_X   = 3 * _L

_NEG_INF = jnp.float32(-1e30)   # softmax padding mask baked into the bias slab


# --------------------------------------------------------------------------------------
# One-time parameter packing (done OUTSIDE the per-step jit).
# --------------------------------------------------------------------------------------
def prepare_params(params):
    hi = jax.lax.Precision.HIGHEST
    emb = jnp.asarray(params["embedding"], jnp.float32)      # (V, E)
    V, E = emb.shape
    W_attn = jnp.asarray(params["W_attn"], jnp.float32)      # (S, E + H)  cat=(emb, h)
    b_attn = jnp.asarray(params["b_attn"], jnp.float32)
    W_comb = jnp.asarray(params["W_comb"], jnp.float32)      # (H, E + H)  cat=(emb, attn_applied)
    b_comb = jnp.asarray(params["b_comb"], jnp.float32)
    W_ih = jnp.asarray(params["W_ih"], jnp.float32)          # (3H, H)  gate order r, z, n
    W_hh = jnp.asarray(params["W_hh"], jnp.float32)
    b_ih = jnp.asarray(params["b_ih"], jnp.float32)
    b_hh = jnp.asarray(params["b_hh"], jnp.float32)
    W_fc = jnp.asarray(params["W_fc"], jnp.float32)          # (O, H)
    b_fc = jnp.asarray(params["b_fc"], jnp.float32)

    S = W_attn.shape[0]
    H = W_comb.shape[0]
    O = W_fc.shape[0]
    assert H % 8 == 0 and max(S, H, O, V) <= _L, "packing assumptions violated"

    # Fold the embedding gather into the first-stage weights:
    #   embedded @ Wa_e  ==  one_hot(tok) @ (emb_table @ Wa_e)
    tok_to_logits = jnp.dot(emb, W_attn[:, :E].T, precision=hi)   # (V, S)
    tok_to_comb   = jnp.dot(emb, W_comb[:, :E].T, precision=hi)   # (V, H)
    h_to_logits   = W_attn[:, E:].T                               # (H, S)
    whh_t = W_hh.T                                                # (H, 3H) [r | z | n]
    wih_t = W_ih.T                                                # (H, 3H)
    wc_a  = W_comb[:, E:].T                                       # (H, H)
    wfc   = W_fc.T                                                # (H, O)

    # Row-padded slab: 128 rows, only the first V / H rows of each segment are nonzero.
    W = jnp.zeros((_L, _N_COLS), jnp.float32)
    W = W.at[:V, _OFF_TOK            : _OFF_TOK + S].set(tok_to_logits)
    W = W.at[:V, _OFF_TOK + _L       : _OFF_TOK + _L + H].set(tok_to_comb)
    W = W.at[:H, _OFF_H              : _OFF_H + S].set(h_to_logits)
    W = W.at[:H, _OFF_H + 1 * _L     : _OFF_H + 1 * _L + H].set(whh_t[:, 0:H])
    W = W.at[:H, _OFF_H + 2 * _L     : _OFF_H + 2 * _L + H].set(whh_t[:, H:2 * H])
    W = W.at[:H, _OFF_H + 3 * _L     : _OFF_H + 3 * _L + H].set(whh_t[:, 2 * H:])
    W = W.at[:H, _OFF_A              : _OFF_A + H].set(wc_a)
    W = W.at[:H, _OFF_X              : _OFF_X + H].set(wih_t[:, 0:H])
    W = W.at[:H, _OFF_X + 1 * _L     : _OFF_X + 1 * _L + H].set(wih_t[:, H:2 * H])
    W = W.at[:H, _OFF_X + 2 * _L     : _OFF_X + 2 * _L + H].set(wih_t[:, 2 * H:])
    W = W.at[:H, _OFF_FC             : _OFF_FC + O].set(wfc)

    b = jnp.zeros((1, _N_COLS), jnp.float32)
    b = b.at[0, _OFF_TOK          : _OFF_TOK + S].set(b_attn)
    # Softmax mask baked into the bias: padding lanes of the logits tile get -1e30,
    # so exp() of those lanes is exactly 0 and attn_w comes out zero-padded to 128.
    b = b.at[0, _OFF_TOK + S      : _OFF_TOK + _L].set(_NEG_INF)
    b = b.at[0, _OFF_TOK + _L     : _OFF_TOK + _L + H].set(b_comb)
    b = b.at[0, _OFF_H + 1 * _L   : _OFF_H + 1 * _L + H].set(b_hh[0:H])
    b = b.at[0, _OFF_H + 2 * _L   : _OFF_H + 2 * _L + H].set(b_hh[H:2 * H])
    b = b.at[0, _OFF_H + 3 * _L   : _OFF_H + 3 * _L + H].set(b_hh[2 * H:])
    b = b.at[0, _OFF_X            : _OFF_X + H].set(b_ih[0:H])
    b = b.at[0, _OFF_X + 1 * _L   : _OFF_X + 1 * _L + H].set(b_ih[H:2 * H])
    b = b.at[0, _OFF_X + 2 * _L   : _OFF_X + 2 * _L + H].set(b_ih[2 * H:])
    b = b.at[0, _OFF_FC           : _OFF_FC + O].set(b_fc)
    return W, b


# --------------------------------------------------------------------------------------
# Kernel: one grid step == one decoder step.  Hidden state carried in VMEM scratch at
# full 128-lane width (lanes H..128 stay exactly zero by construction).
# --------------------------------------------------------------------------------------
def _make_step_kernel(S, H):
    def kernel(tok_ref, h0_ref, enc_ref, w_ref, b_ref, out_ref, h_scr):
        t = pl.program_id(0)
        B = h_scr.shape[0]

        @pl.when(t == 0)
        def _init():
            h_scr[...] = jnp.zeros_like(h_scr)
            h_scr[:, 0:H] = h0_ref[0]

        h = h_scr[...]                                     # (B, 128), zero beyond H

        # Embedding lookup fused as a one-hot matmul against the embedding-folded slab.
        tok = tok_ref[0]                                   # (B, 1) int32
        onehot = (tok == jax.lax.broadcasted_iota(jnp.int32, (B, _L), 1)).astype(jnp.float32)

        # Stage 1: one wide MXU push per LHS (token side and hidden side).
        r_tok = jnp.dot(onehot, w_ref[:, _OFF_TOK:_OFF_TOK + _W_TOK],
                        preferred_element_type=jnp.float32) + b_ref[:, _OFF_TOK:_OFF_TOK + _W_TOK]
        r_h = jnp.dot(h, w_ref[:, _OFF_H:_OFF_H + _W_H],
                      preferred_element_type=jnp.float32) + b_ref[:, _OFF_H:_OFF_H + _W_H]

        # Softmax over the full 128-lane tile; padding lanes carry the -1e30 bias mask,
        # so they contribute exp == 0 and attn_w is zero-padded to 128 lanes for free.
        logits = r_tok[:, 0:_L] + r_h[:, 0:_L]
        m = jnp.max(logits, axis=1, keepdims=True)
        e = jnp.exp(logits - m)
        attn_w = e * pl.reciprocal(jnp.sum(e, axis=1, keepdims=True), approx=True)   # (B, 128)

        comb_e = r_tok[:, _L:2 * _L]                       # (B, 128), zero beyond H (has b_comb)
        gh_r = r_h[:, 1 * _L:2 * _L]                       # tile-aligned GRU hh gates, full width
        gh_z = r_h[:, 2 * _L:3 * _L]
        gh_n = r_h[:, 3 * _L:4 * _L]

        # attn_applied = sum_s attn_w[:, s] * enc[s]  (encoder stays in (S, B, H) layout)
        enc = enc_ref[...]
        attn_applied = attn_w[:, 0:1] * enc[0]
        for s in range(1, S):
            attn_applied = attn_applied + attn_w[:, s:s + 1] * enc[s]     # (B, H)

        # attn_combine (bias already folded into comb_e) -> ReLU.  Padding lanes stay 0.
        comb = comb_e + jnp.dot(attn_applied, w_ref[0:H, _OFF_A:_OFF_A + _L],
                                preferred_element_type=jnp.float32)
        x_t = jnp.maximum(comb, 0.0)                       # (B, 128), zero beyond H

        # GRU cell, PyTorch gate order (r, z, n); each gate on its own 128-lane tile.
        r_x = jnp.dot(x_t, w_ref[:, _OFF_X:_OFF_X + _W_X],
                      preferred_element_type=jnp.float32) + b_ref[:, _OFF_X:_OFF_X + _W_X]
        gi_r = r_x[:, 0:_L]
        gi_z = r_x[:, 1 * _L:2 * _L]
        gi_n = r_x[:, 2 * _L:3 * _L]

        rg = jax.nn.sigmoid(gi_r + gh_r)
        zg = jax.nn.sigmoid(gi_z + gh_z)
        ng = jnp.tanh(gi_n + rg * gh_n)
        h_new = (1.0 - zg) * ng + zg * h                   # (B, 128), zero beyond H
        h_scr[...] = h_new

        pred = jnp.dot(h_new, w_ref[:, _OFF_FC:_OFF_FC + _L],
                       preferred_element_type=jnp.float32) + b_ref[:, _OFF_FC:_OFF_FC + _L]

        # Single lane-dense output store per step:
        #   [tile0: pred(pad) | tile1: h_new(pad) | tile2: attn_w(pad)]
        out_ref[0, :, :] = jnp.concatenate([pred, h_new, attn_w], axis=1)

    return kernel


def _decode_steps_pallas(tokens, hidden, encoder_outputs, W, b):
    """tokens (T, B) int32, hidden (1, B, H), encoder_outputs (S, B, H) -> (T, B, 384) slab."""
    T, B = tokens.shape
    H = hidden.shape[2]
    S = encoder_outputs.shape[0]
    kernel = _make_step_kernel(S=S, H=H)
    out = pl.pallas_call(
        kernel,
        out_shape=jax.ShapeDtypeStruct((T, B, 3 * _L), jnp.float32),
        grid=(T,),
        in_specs=[
            pl.BlockSpec((1, B, 1), lambda t: (t, 0, 0)),          # token for step t
            pl.BlockSpec((1, B, H), lambda t: (0, 0, 0)),          # initial hidden (resident)
            pl.BlockSpec((S, B, H), lambda t: (0, 0, 0)),          # encoder outputs (resident)
            pl.BlockSpec((_L, _N_COLS), lambda t: (0, 0)),         # packed weight slab (resident)
            pl.BlockSpec((1, _N_COLS), lambda t: (0, 0)),          # packed bias slab (resident)
        ],
        out_specs=pl.BlockSpec((1, B, 3 * _L), lambda t: (t, 0, 0)),
        scratch_shapes=[pltpu.VMEM((B, _L), jnp.float32)],         # hidden carried across steps
        compiler_params=pltpu.CompilerParams(
            dimension_semantics=("arbitrary",),                    # sequential: hidden carry
        ),
    )(tokens[:, :, None].astype(jnp.int32), hidden, encoder_outputs, W, b)
    return out


# --------------------------------------------------------------------------------------
# Public wrappers (single step == module forward; multi-step amortizes the call overhead).
# --------------------------------------------------------------------------------------
@functools.partial(jax.jit, static_argnames=("out_dim",))
def attn_decoder_forward(x_tok, hidden, encoder_outputs, W, b, *, out_dim):
    """One decoder step. x_tok (B,), hidden (1,B,H), encoder_outputs (S,B,H)."""
    H = hidden.shape[2]
    S = encoder_outputs.shape[0]
    out = _decode_steps_pallas(x_tok[None, :], hidden, encoder_outputs, W, b)
    pred = out[0, :, 0:out_dim]
    h_new = out[0, :, _L:_L + H][None]
    attn_w = out[0, :, 2 * _L:2 * _L + S]
    return pred, h_new, attn_w


@functools.partial(jax.jit, static_argnames=("out_dim",))
def attn_decoder_forward_steps(tokens, hidden, encoder_outputs, W, b, *, out_dim):
    """T teacher-forced decoder steps in ONE pallas_call. tokens (T, B) int32."""
    H = hidden.shape[2]
    S = encoder_outputs.shape[0]
    out = _decode_steps_pallas(tokens, hidden, encoder_outputs, W, b)
    preds = out[:, :, 0:out_dim]                   # (T, B, O)
    h_last = out[-1, :, _L:_L + H][None]           # (1, B, H)
    attn_ws = out[:, :, 2 * _L:2 * _L + S]         # (T, B, S)
    return preds, h_last, attn_ws


# --------------------------------------------------------------------------------------
# Pure-JAX reference (mirrors the PyTorch forward exactly, GRU cell included)
# --------------------------------------------------------------------------------------
def attn_decoder_reference(x_tok, hidden, encoder_outputs, params):
    embedded = params["embedding"][x_tok]            # (B, E)
    h0 = hidden[0]                                   # (B, H)
    H = h0.shape[1]

    attn_in = jnp.concatenate([embedded, h0], axis=1)
    logits = attn_in @ params["W_attn"].T + params["b_attn"]
    attn_w = jax.nn.softmax(logits, axis=1)                          # (B, S)
    enc_bsh = jnp.transpose(encoder_outputs, (1, 0, 2))              # (B, S, H)
    attn_applied = jnp.einsum("bs,bsh->bh", attn_w, enc_bsh)         # (B, H)

    comb_in = jnp.concatenate([embedded, attn_applied], axis=1)
    x_t = jax.nn.relu(comb_in @ params["W_comb"].T + params["b_comb"])

    gi = x_t @ params["W_ih"].T + params["b_ih"]
    gh = h0 @ params["W_hh"].T + params["b_hh"]
    i_r, i_z, i_n = gi[:, :H], gi[:, H:2 * H], gi[:, 2 * H:]
    h_r, h_z, h_n = gh[:, :H], gh[:, H:2 * H], gh[:, 2 * H:]
    r = jax.nn.sigmoid(i_r + h_r)
    z = jax.nn.sigmoid(i_z + h_z)
    n = jnp.tanh(i_n + r * h_n)
    h_new = (1.0 - z) * n + z * h0

    pred = h_new @ params["W_fc"].T + params["b_fc"]
    return pred, h_new[None, ...], attn_w


# --------------------------------------------------------------------------------------
if __name__ == "__main__":
    # Module config (GRU, 1 layer, unidirectional):
    #   output_dim=16, hidden_dim=32, embedding_size=32, max_length=6 -> S = max_length+2 = 8
    # TODO(synk): LSTM/RNN cell types and bidirectional=True branches are not implemented
    #             (this kernel covers the GRU / num_layers=1 / unidirectional configuration;
    #             GRU inter-layer dropout is a no-op for num_layers=1).
    OUTPUT_DIM = 16
    HIDDEN = 32
    EMB = 32
    MAX_LEN = 6
    S = MAX_LEN + 2
    B = 8
    T = 4

    key = jax.random.PRNGKey(0)
    keys = jax.random.split(key, 16)

    def init(k, shape, scale=0.1):
        return (scale * jax.random.normal(k, shape)).astype(jnp.float32)

    params = {
        "embedding": init(keys[0], (OUTPUT_DIM, EMB)),
        "W_attn":    init(keys[1], (S, HIDDEN + EMB)),
        "b_attn":    init(keys[2], (S,)),
        "W_comb":    init(keys[3], (HIDDEN, HIDDEN + EMB)),
        "b_comb":    init(keys[4], (HIDDEN,)),
        "W_ih":      init(keys[5], (3 * HIDDEN, HIDDEN)),
        "W_hh":      init(keys[6], (3 * HIDDEN, HIDDEN)),
        "b_ih":      init(keys[7], (3 * HIDDEN,)),
        "b_hh":      init(keys[8], (3 * HIDDEN,)),
        "W_fc":      init(keys[9], (OUTPUT_DIM, HIDDEN)),
        "b_fc":      init(keys[10], (OUTPUT_DIM,)),
    }

    # One-time parameter packing (outside the per-step jit).
    W_packed, b_packed = prepare_params(params)

    x_tok = jax.random.randint(keys[11], (B,), 0, OUTPUT_DIM, dtype=jnp.int32)
    hidden = init(keys[12], (1, B, HIDDEN), scale=1.0)
    encoder_outputs = init(keys[13], (S, B, HIDDEN), scale=1.0)

    # Tolerances loosened (approx EUP reciprocal in softmax + embedding-folded weights).
    TOL = dict(atol=5e-3, rtol=5e-3)

    # --- single step (module forward semantics) ---
    pred, h_new, attn_w = attn_decoder_forward(
        x_tok, hidden, encoder_outputs, W_packed, b_packed, out_dim=OUTPUT_DIM)
    jax.block_until_ready((pred, h_new, attn_w))

    pred_r, h_new_r, attn_w_r = attn_decoder_reference(x_tok, hidden, encoder_outputs, params)
    np.testing.assert_allclose(np.asarray(pred), np.asarray(pred_r), **TOL)
    np.testing.assert_allclose(np.asarray(h_new), np.asarray(h_new_r), **TOL)
    np.testing.assert_allclose(np.asarray(attn_w), np.asarray(attn_w_r), **TOL)

    # --- multi-step (T teacher-forced steps in ONE pallas_call) ---
    tokens = jax.random.randint(keys[14], (T, B), 0, OUTPUT_DIM, dtype=jnp.int32)
    preds, h_last, attn_ws = attn_decoder_forward_steps(
        tokens, hidden, encoder_outputs, W_packed, b_packed, out_dim=OUTPUT_DIM)
    jax.block_until_ready((preds, h_last, attn_ws))

    h_ref = hidden
    preds_r, attns_r = [], []
    for t in range(T):
        p_r, h_ref, a_r = attn_decoder_reference(tokens[t], h_ref, encoder_outputs, params)
        preds_r.append(p_r)
        attns_r.append(a_r)
    np.testing.assert_allclose(np.asarray(preds), np.stack([np.asarray(p) for p in preds_r]), **TOL)
    np.testing.assert_allclose(np.asarray(attn_ws), np.stack([np.asarray(a) for a in attns_r]), **TOL)
    np.testing.assert_allclose(np.asarray(h_last), np.asarray(h_ref), **TOL)

    print("KERNEL_OK")
</pallas_src>

<mosaic_0001>
module attributes {stable_mosaic.version = 11 : i64} {
  func.func @kernel(%arg0: i32, %arg1: memref<1x8x1xi32, #tpu.memory_space<vmem>>, %arg2: memref<1x8x32xf32, #tpu.memory_space<vmem>>, %arg3: memref<8x8x32xf32, #tpu.memory_space<vmem>>, %arg4: memref<128x1408xf32, #tpu.memory_space<vmem>>, %arg5: memref<1x1408xf32, #tpu.memory_space<vmem>>, %arg6: memref<1x8x384xf32, #tpu.memory_space<vmem>>, %arg7: memref<8x128xf32, #tpu.memory_space<vmem>>) attributes {dimension_semantics = [#tpu.dimension_semantics<arbitrary>], iteration_bounds = array<i64: 1>, scalar_prefetch = 0 : i64, scratch_operands = 1 : i64, tpu.core_type = #tpu.core_type<tc>, window_params = [{transform_indices = @transform_0, window_bounds = array<i64: 1, 8, 1>}, {pipeline_mode = #tpu.pipeline_mode<synchronous>, transform_indices = @transform_1, window_bounds = array<i64: 1, 8, 32>}, {pipeline_mode = #tpu.pipeline_mode<synchronous>, transform_indices = @transform_2, window_bounds = array<i64: 8, 8, 32>}, {pipeline_mode = #tpu.pipeline_mode<synchronous>, transform_indices = @transform_3, window_bounds = array<i64: 128, 1408>}, {pipeline_mode = #tpu.pipeline_mode<synchronous>, transform_indices = @transform_4, window_bounds = array<i64: 1, 1408>}, {transform_indices = @transform_5, window_bounds = array<i64: 1, 8, 384>}]} {
    %c0_i32 = arith.constant 0 : i32
    %0 = arith.cmpi eq, %arg0, %c0_i32 : i32
    %1 = arith.extui %0 : i1 to i32
    %c0_i32_0 = arith.constant 0 : i32
    %2 = arith.cmpi ne, %1, %c0_i32_0 : i32
    scf.if %2 {
      %cst_37 = arith.constant 0.000000e+00 : f32
      %129 = vector.broadcast %cst_37 : f32 to vector<8x128xf32>
      %c0_38 = arith.constant 0 : index
      %c0_39 = arith.constant 0 : index
      %130 = vector.load %arg7[%c0_38, %c0_39] : memref<8x128xf32, #tpu.memory_space<vmem>>, vector<8x128xf32>
      tpu.vector_store %arg7[%c0_38, %c0_39], %129 {strides = array<i32>} : memref<8x128xf32, #tpu.memory_space<vmem>>, vector<8x128xf32>,
      %c0_40 = arith.constant 0 : index
      %c0_41 = arith.constant 0 : index
      %c0_42 = arith.constant 0 : index
      %131 = vector.load %arg2[%c0_40, %c0_41, %c0_42] : memref<1x8x32xf32, #tpu.memory_space<vmem>>, vector<1x8x32xf32>
      %132 = vector.shape_cast %131 : vector<1x8x32xf32> to vector<8x32xf32>
      %c0_43 = arith.constant 0 : index
      %c0_44 = arith.constant 0 : index
      %133 = vector.load %arg7[%c0_43, %c0_44] : memref<8x128xf32, #tpu.memory_space<vmem>>, vector<8x32xf32>
      tpu.vector_store %arg7[%c0_43, %c0_44], %132 {strides = array<i32>} : memref<8x128xf32, #tpu.memory_space<vmem>>, vector<8x32xf32>,
    } else {
    }
    %c0 = arith.constant 0 : index
    %c0_1 = arith.constant 0 : index
    %3 = vector.load %arg7[%c0, %c0_1] : memref<8x128xf32, #tpu.memory_space<vmem>>, vector<8x128xf32>
    %c0_2 = arith.constant 0 : index
    %c0_3 = arith.constant 0 : index
    %c0_4 = arith.constant 0 : index
    %4 = vector.load %arg1[%c0_2, %c0_3, %c0_4] : memref<1x8x1xi32, #tpu.memory_space<vmem>>, vector<1x8x1xi32>
    %5 = vector.shape_cast %4 : vector<1x8x1xi32> to vector<8x1xi32>
    %6 = tpu.iota {dimensions = array<i32: 1>} : vector<8x128xi32>
    %7 = vector.broadcast %5 : vector<8x1xi32> to vector<8x128xi32>
    %8 = arith.cmpi eq, %7, %6 : vector<8x128xi32>
    %9 = arith.extui %8 : vector<8x128xi1> to vector<8x128xi32>
    %10 = arith.sitofp %9 : vector<8x128xi32> to vector<8x128xf32>
    %c0_5 = arith.constant 0 : index
    %c0_6 = arith.constant 0 : index
    %11 = vector.load %arg4[%c0_5, %c0_6] : memref<128x1408xf32, #tpu.memory_space<vmem>>, vector<128x256xf32>
    %cst = arith.constant dense<0.000000e+00> : vector<8x256xf32>
    %12 = tpu.matmul %10, %11, %cst {dimension_numbers = #tpu.dot_dimension_numbers<[1], [0], [0], [1], [0, 0, 1, 1], [], []>} : vector<8x128xf32>, vector<128x256xf32>, vector<8x256xf32> -> vector<8x256xf32>
    %c0_7 = arith.constant 0 : index
    %c0_8 = arith.constant 0 : index
    %13 = vector.load %arg5[%c0_7, %c0_8] : memref<1x1408xf32, #tpu.memory_space<vmem>>, vector<1x256xf32>
    %14 = vector.broadcast %13 : vector<1x256xf32> to vector<8x256xf32>
    %15 = arith.addf %12, %14 : vector<8x256xf32>
    %c0_9 = arith.constant 0 : index
    %c256 = arith.constant 256 : index
    %16 = vector.load %arg4[%c0_9, %c256] : memref<128x1408xf32, #tpu.memory_space<vmem>>, vector<128x512xf32>
    %cst_10 = arith.constant dense<0.000000e+00> : vector<8x512xf32>
    %17 = tpu.matmul %3, %16, %cst_10 {dimension_numbers = #tpu.dot_dimension_numbers<[1], [0], [0], [1], [0, 0, 1, 1], [], []>} : vector<8x128xf32>, vector<128x512xf32>, vector<8x512xf32> -> vector<8x512xf32>
    %c0_11 = arith.constant 0 : index
    %c256_12 = arith.constant 256 : index
    %18 = vector.load %arg5[%c0_11, %c256_12] : memref<1x1408xf32, #tpu.memory_space<vmem>>, vector<1x512xf32>
    %19 = vector.broadcast %18 : vector<1x512xf32> to vector<8x512xf32>
    %20 = arith.addf %17, %19 : vector<8x512xf32>
    %21 = vector.extract_strided_slice %15 {offsets = [0, 0], sizes = [8, 128], strides = [1, 1]} : vector<8x256xf32> to vector<8x128xf32>
    %22 = vector.extract_strided_slice %20 {offsets = [0, 0], sizes = [8, 128], strides = [1, 1]} : vector<8x512xf32> to vector<8x128xf32>
    %23 = arith.addf %21, %22 : vector<8x128xf32>
    %cst_13 = arith.constant dense<0xFF800000> : vector<8xf32>
    %24 = vector.multi_reduction <maximumf>, %23, %cst_13 [1] : vector<8x128xf32> to vector<8xf32>
    %25 = vector.shape_cast %24 : vector<8xf32> to vector<8x1xf32>
    %26 = vector.broadcast %25 : vector<8x1xf32> to vector<8x128xf32>
    %27 = arith.subf %23, %26 : vector<8x128xf32>
    %28 = math.exp %27 : vector<8x128xf32>
    %cst_14 = arith.constant dense<0.000000e+00> : vector<8xf32>
    %29 = vector.multi_reduction <add>, %28, %cst_14 [1] : vector<8x128xf32> to vector<8xf32>
    %30 = vector.shape_cast %29 : vector<8xf32> to vector<8x1xf32>
    %31 = tpu.reciprocal %30 {approx = true} : vector<8x1xf32> -> vector<8x1xf32>
    %32 = vector.broadcast %31 : vector<8x1xf32> to vector<8x128xf32>
    %33 = arith.mulf %28, %32 : vector<8x128xf32>
    %34 = vector.extract_strided_slice %15 {offsets = [0, 128], sizes = [8, 128], strides = [1, 1]} : vector<8x256xf32> to vector<8x128xf32>
    %35 = vector.extract_strided_slice %20 {offsets = [0, 128], sizes = [8, 128], strides = [1, 1]} : vector<8x512xf32> to vector<8x128xf32>
    %36 = vector.extract_strided_slice %20 {offsets = [0, 256], sizes = [8, 128], strides = [1, 1]} : vector<8x512xf32> to vector<8x128xf32>
    %37 = vector.extract_strided_slice %20 {offsets = [0, 384], sizes = [8, 128], strides = [1, 1]} : vector<8x512xf32> to vector<8x128xf32>
    %c0_15 = arith.constant 0 : index
    %c0_16 = arith.constant 0 : index
    %c0_17 = arith.constant 0 : index
    %38 = vector.load %arg3[%c0_15, %c0_16, %c0_17] : memref<8x8x32xf32, #tpu.memory_space<vmem>>, vector<8x8x32xf32>
    %39 = vector.extract_strided_slice %33 {offsets = [0, 0], sizes = [8, 1], strides = [1, 1]} : vector<8x128xf32> to vector<8x1xf32>
    %40 = vector.extract_strided_slice %38 {offsets = [0, 0, 0], sizes = [1, 8, 32], strides = [1, 1, 1]} : vector<8x8x32xf32> to vector<1x8x32xf32>
    %41 = vector.shape_cast %40 : vector<1x8x32xf32> to vector<8x32xf32>
    %42 = vector.broadcast %39 : vector<8x1xf32> to vector<8x32xf32>
    %43 = arith.mulf %42, %41 : vector<8x32xf32>
    %44 = vector.extract_strided_slice %33 {offsets = [0, 1], sizes = [8, 1], strides = [1, 1]} : vector<8x128xf32> to vector<8x1xf32>
    %45 = vector.extract_strided_slice %38 {offsets = [1, 0, 0], sizes = [1, 8, 32], strides = [1, 1, 1]} : vector<8x8x32xf32> to vector<1x8x32xf32>
    %46 = vector.shape_cast %45 : vector<1x8x32xf32> to vector<8x32xf32>
    %47 = vector.broadcast %44 : vector<8x1xf32> to vector<8x32xf32>
    %48 = arith.mulf %47, %46 : vector<8x32xf32>
    %49 = arith.addf %43, %48 : vector<8x32xf32>
    %50 = vector.extract_strided_slice %33 {offsets = [0, 2], sizes = [8, 1], strides = [1, 1]} : vector<8x128xf32> to vector<8x1xf32>
    %51 = vector.extract_strided_slice %38 {offsets = [2, 0, 0], sizes = [1, 8, 32], strides = [1, 1, 1]} : vector<8x8x32xf32> to vector<1x8x32xf32>
    %52 = vector.shape_cast %51 : vector<1x8x32xf32> to vector<8x32xf32>
    %53 = vector.broadcast %50 : vector<8x1xf32> to vector<8x32xf32>
    %54 = arith.mulf %53, %52 : vector<8x32xf32>
    %55 = arith.addf %49, %54 : vector<8x32xf32>
    %56 = vector.extract_strided_slice %33 {offsets = [0, 3], sizes = [8, 1], strides = [1, 1]} : vector<8x128xf32> to vector<8x1xf32>
    %57 = vector.extract_strided_slice %38 {offsets = [3, 0, 0], sizes = [1, 8, 32], strides = [1, 1, 1]} : vector<8x8x32xf32> to vector<1x8x32xf32>
    %58 = vector.shape_cast %57 : vector<1x8x32xf32> to vector<8x32xf32>
    %59 = vector.broadcast %56 : vector<8x1xf32> to vector<8x32xf32>
    %60 = arith.mulf %59, %58 : vector<8x32xf32>
    %61 = arith.addf %55, %60 : vector<8x32xf32>
    %62 = vector.extract_strided_slice %33 {offsets = [0, 4], sizes = [8, 1], strides = [1, 1]} : vector<8x128xf32> to vector<8x1xf32>
    %63 = vector.extract_strided_slice %38 {offsets = [4, 0, 0], sizes = [1, 8, 32], strides = [1, 1, 1]} : vector<8x8x32xf32> to vector<1x8x32xf32>
    %64 = vector.shape_cast %63 : vector<1x8x32xf32> to vector<8x32xf32>
    %65 = vector.broadcast %62 : vector<8x1xf32> to vector<8x32xf32>
    %66 = arith.mulf %65, %64 : vector<8x32xf32>
    %67 = arith.addf %61, %66 : vector<8x32xf32>
    %68 = vector.extract_strided_slice %33 {offsets = [0, 5], sizes = [8, 1], strides = [1, 1]} : vector<8x128xf32> to vector<8x1xf32>
    %69 = vector.extract_strided_slice %38 {offsets = [5, 0, 0], sizes = [1, 8, 32], strides = [1, 1, 1]} : vector<8x8x32xf32> to vector<1x8x32xf32>
    %70 = vector.shape_cast %69 : vector<1x8x32xf32> to vector<8x32xf32>
    %71 = vector.broadcast %68 : vector<8x1xf32> to vector<8x32xf32>
    %72 = arith.mulf %71, %70 : vector<8x32xf32>
    %73 = arith.addf %67, %72 : vector<8x32xf32>
    %74 = vector.extract_strided_slice %33 {offsets = [0, 6], sizes = [8, 1], strides = [1, 1]} : vector<8x128xf32> to vector<8x1xf32>
    %75 = vector.extract_strided_slice %38 {offsets = [6, 0, 0], sizes = [1, 8, 32], strides = [1, 1, 1]} : vector<8x8x32xf32> to vector<1x8x32xf32>
    %76 = vector.shape_cast %75 : vector<1x8x32xf32> to vector<8x32xf32>
    %77 = vector.broadcast %74 : vector<8x1xf32> to vector<8x32xf32>
    %78 = arith.mulf %77, %76 : vector<8x32xf32>
    %79 = arith.addf %73, %78 : vector<8x32xf32>
    %80 = vector.extract_strided_slice %33 {offsets = [0, 7], sizes = [8, 1], strides = [1, 1]} : vector<8x128xf32> to vector<8x1xf32>
    %81 = vector.extract_strided_slice %38 {offsets = [7, 0, 0], sizes = [1, 8, 32], strides = [1, 1, 1]} : vector<8x8x32xf32> to vector<1x8x32xf32>
    %82 = vector.shape_cast %81 : vector<1x8x32xf32> to vector<8x32xf32>
    %83 = vector.broadcast %80 : vector<8x1xf32> to vector<8x32xf32>
    %84 = arith.mulf %83, %82 : vector<8x32xf32>
    %85 = arith.addf %79, %84 : vector<8x32xf32>
    %c0_18 = arith.constant 0 : index
    %c768 = arith.constant 768 : index
    %86 = vector.load %arg4[%c0_18, %c768] : memref<128x1408xf32, #tpu.memory_space<vmem>>, vector<32x128xf32>
    %cst_19 = arith.constant dense<0.000000e+00> : vector<8x128xf32>
    %87 = tpu.matmul %85, %86, %cst_19 {dimension_numbers = #tpu.dot_dimension_numbers<[1], [0], [0], [1], [0, 0, 1, 1], [], []>} : vector<8x32xf32>, vector<32x128xf32>, vector<8x128xf32> -> vector<8x128xf32>
    %88 = arith.addf %34, %87 : vector<8x128xf32>
    %cst_20 = arith.constant 0.000000e+00 : f32
    %89 = vector.broadcast %cst_20 : f32 to vector<8x128xf32>
    %90 = arith.maximumf %88, %89 : vector<8x128xf32>
    %c0_21 = arith.constant 0 : index
    %c896 = arith.constant 896 : index
    %91 = vector.load %arg4[%c0_21, %c896] : memref<128x1408xf32, #tpu.memory_space<vmem>>, vector<128x384xf32>
    %cst_22 = arith.constant dense<0.000000e+00> : vector<8x384xf32>
    %92 = tpu.matmul %90, %91, %cst_22 {dimension_numbers = #tpu.dot_dimension_numbers<[1], [0], [0], [1], [0, 0, 1, 1], [], []>} : vector<8x128xf32>, vector<128x384xf32>, vector<8x384xf32> -> vector<8x384xf32>
    %c0_23 = arith.constant 0 : index
    %c896_24 = arith.constant 896 : index
    %93 = vector.load %arg5[%c0_23, %c896_24] : memref<1x1408xf32, #tpu.memory_space<vmem>>, vector<1x384xf32>
    %94 = vector.broadcast %93 : vector<1x384xf32> to vector<8x384xf32>
    %95 = arith.addf %92, %94 : vector<8x384xf32>
    %96 = vector.extract_strided_slice %95 {offsets = [0, 0], sizes = [8, 128], strides = [1, 1]} : vector<8x384xf32> to vector<8x128xf32>
    %97 = vector.extract_strided_slice %95 {offsets = [0, 128], sizes = [8, 128], strides = [1, 1]} : vector<8x384xf32> to vector<8x128xf32>
    %98 = vector.extract_strided_slice %95 {offsets = [0, 256], sizes = [8, 128], strides = [1, 1]} : vector<8x384xf32> to vector<8x128xf32>
    %99 = arith.addf %96, %35 : vector<8x128xf32>
    %100 = arith.negf %99 : vector<8x128xf32>
    %101 = math.exp %100 : vector<8x128xf32>
    %cst_25 = arith.constant 1.000000e+00 : f32
    %102 = vector.broadcast %cst_25 : f32 to vector<8x128xf32>
    %103 = arith.addf %102, %101 : vector<8x128xf32>
    %104 = arith.divf %102, %103 : vector<8x128xf32>
    %105 = arith.addf %97, %36 : vector<8x128xf32>
    %106 = arith.negf %105 : vector<8x128xf32>
    %107 = math.exp %106 : vector<8x128xf32>
    %cst_26 = arith.constant 1.000000e+00 : f32
    %108 = vector.broadcast %cst_26 : f32 to vector<8x128xf32>
    %109 = arith.addf %108, %107 : vector<8x128xf32>
    %110 = arith.divf %108, %109 : vector<8x128xf32>
    %111 = arith.mulf %104, %37 : vector<8x128xf32>
    %112 = arith.addf %98, %111 : vector<8x128xf32>
    %113 = math.tanh %112 : vector<8x128xf32>
    %cst_27 = arith.constant 1.000000e+00 : f32
    %114 = vector.broadcast %cst_27 : f32 to vector<8x128xf32>
    %115 = arith.subf %114, %110 : vector<8x128xf32>
    %116 = arith.mulf %115, %113 : vector<8x128xf32>
    %117 = arith.mulf %110, %3 : vector<8x128xf32>
    %118 = arith.addf %116, %117 : vector<8x128xf32>
    %c0_28 = arith.constant 0 : index
    %c0_29 = arith.constant 0 : index
    %119 = vector.load %arg7[%c0_28, %c0_29] : memref<8x128xf32, #tpu.memory_space<vmem>>, vector<8x128xf32>
    tpu.vector_store %arg7[%c0_28, %c0_29], %118 {strides = array<i32>} : memref<8x128xf32, #tpu.memory_space<vmem>>, vector<8x128xf32>,
    %c0_30 = arith.constant 0 : index
    %c1280 = arith.constant 1280 : index
    %120 = vector.load %arg4[%c0_30, %c1280] : memref<128x1408xf32, #tpu.memory_space<vmem>>, vector<128x128xf32>
    %cst_31 = arith.constant dense<0.000000e+00> : vector<8x128xf32>
    %121 = tpu.matmul %118, %120, %cst_31 {dimension_numbers = #tpu.dot_dimension_numbers<[1], [0], [0], [1], [0, 0, 1, 1], [], []>} : vector<8x128xf32>, vector<128x128xf32>, vector<8x128xf32> -> vector<8x128xf32>
    %c0_32 = arith.constant 0 : index
    %c1280_33 = arith.constant 1280 : index
    %122 = vector.load %arg5[%c0_32, %c1280_33] : memref<1x1408xf32, #tpu.memory_space<vmem>>, vector<1x128xf32>
    %123 = vector.broadcast %122 : vector<1x128xf32> to vector<8x128xf32>
    %124 = arith.addf %121, %123 : vector<8x128xf32>
    %125 = tpu.concatenate %124, %118, %33 in 1 : vector<8x128xf32>, vector<8x128xf32>, vector<8x128xf32> -> vector<8x384xf32>
    %c0_34 = arith.constant 0 : index
    %c0_35 = arith.constant 0 : index
    %c0_36 = arith.constant 0 : index
    %126 = vector.load %arg6[%c0_34, %c0_35, %c0_36] : memref<1x8x384xf32, #tpu.memory_space<vmem>>, vector<1x8x384xf32>
    %127 = vector.shape_cast %126 : vector<1x8x384xf32> to vector<8x384xf32>
    %128 = vector.shape_cast %125 : vector<8x384xf32> to vector<1x8x384xf32>
    tpu.vector_store %arg6[%c0_34, %c0_35, %c0_36], %128 {strides = array<i32>} : memref<1x8x384xf32, #tpu.memory_space<vmem>>, vector<1x8x384xf32>,
    return
  }
  func.func @transform_0(%arg0: i32) -> (i32, i32, i32) {
    %c0_i32 = arith.constant 0 : i32
    %c0_i32_0 = arith.constant 0 : i32
    %c0_i32_1 = arith.constant 0 : i32
    return %arg0, %c0_i32, %c0_i32_0 : i32, i32, i32
  }
  func.func @transform_1(%arg0: i32) -> (i32, i32, i32) {
    %c0_i32 = arith.constant 0 : i32
    %c0_i32_0 = arith.constant 0 : i32
    %c0_i32_1 = arith.constant 0 : i32
    %c0_i32_2 = arith.constant 0 : i32
    return %c0_i32, %c0_i32_0, %c0_i32_1 : i32, i32, i32
  }
  func.func @transform_2(%arg0: i32) -> (i32, i32, i32) {
    %c0_i32 = arith.constant 0 : i32
    %c0_i32_0 = arith.constant 0 : i32
    %c0_i32_1 = arith.constant 0 : i32
    %c0_i32_2 = arith.constant 0 : i32
    return %c0_i32, %c0_i32_0, %c0_i32_1 : i32, i32, i32
  }
  func.func @transform_3(%arg0: i32) -> (i32, i32) {
    %c0_i32 = arith.constant 0 : i32
    %c0_i32_0 = arith.constant 0 : i32
    %c0_i32_1 = arith.constant 0 : i32
    return %c0_i32, %c0_i32_0 : i32, i32
  }
  func.func @transform_4(%arg0: i32) -> (i32, i32) {
    %c0_i32 = arith.constant 0 : i32
    %c0_i32_0 = arith.constant 0 : i32
    %c0_i32_1 = arith.constant 0 : i32
    return %c0_i32, %c0_i32_0 : i32, i32
  }
  func.func @transform_5(%arg0: i32) -> (i32, i32, i32) {
    %c0_i32 = arith.constant 0 : i32
    %c0_i32_0 = arith.constant 0 : i32
    %c0_i32_1 = arith.constant 0 : i32
    return %arg0, %c0_i32, %c0_i32_0 : i32, i32, i32
  }
}

</mosaic_0001>

<bundles_post_ra>
// kernel: attn_decoder_forward.1
= control target key start
LH: loop header
LB: loop body
LE: loop exit
PB: predicated region body
PF: predicated region fallthrough
CT: control target
= control target key end

     0   :  { %10 = vsyncpa [#allocation4], 0  ;;  %s1456_s0 = inlined_call_operand.vmem [shape: s32[1,8,1], index: 0, kind: input, shape index: {}]   ;;  %s1457_s1 = inlined_call_operand.vmem [shape: f32[1,8,32], index: 1, kind: input, shape index: {}]   ;;  %s1458_s2 = inlined_call_operand.hbm [shape: f32[8,8,32], index: 2, kind: input, shape index: {}]   ;;  %s1459_s3 = inlined_call_operand.hbm [shape: f32[128,1408], index: 3, kind: input, shape index: {}]   ;;  %s1460_s4 = inlined_call_operand.vmem [shape: f32[1,1408], index: 4, kind: input, shape index: {}]   ;;  %s1461_s5 = inlined_call_operand.vmem [shape: f32[1,8,384], index: 5, kind: output, shape index: {}]  }
   0x1   :  { %11 = vsyncpa [#allocation6], 0  ;;  %s1283_s18 = smov [#allocation3]   ;;  %s1235_s22 = scalar_lea.hbm %s1458_s2, 1024 }
   0x2   :  { %s21_s19 = sshll.u32 %s1283_s18, 4  ;;  %p1236_p0 = scmp.ne.s32.totalorder %s1458_s2, %s1235_s22  ;;  %s22_s19 = int_to_ptr.vmem [resolvable:$true] %s21_s19 }
   0x3   :  { %p1239_p1 = scmp.lt.u32.totalorder %s1235_s22, %s1458_s2 }
   0x5   :  { %p1241_p2 = pnand %p1239_p1, %p1236_p0 }
   0x7   :  { %1244 = shalt.err (!%p1241_p2)
}
   0x8   :  { %s1245_s27 = scalar_lea.vmem %s22_s19, 1024  ;;  %p1250_p4 = scmp.lt.s32.totalorder %s22_s19, %s22_s19 }
   0x9   :  { %p1246_p3 = scmp.ne.s32.totalorder %s22_s19, %s1245_s27  ;;  %p1251_p5 = scmp.lt.s32.totalorder %s1245_s27, %s1245_s27 }
   0xb   :  { %p1252_p6 = por %p1251_p5, %p1250_p4 }
   0xd   :  { %p1253_p7 = pnand %p1252_p6, %p1246_p3 }
   0xf   :  { %1256 = shalt.err (!%p1253_p7)
}
  0x10   :  { %s1284_s28 = smov 128   ;;  %s1285_s29 = smov 8  }
  0x11   :  { %27 = dma.hbm_to_vmem [thread:$0]  %s1458_s2, 1024, %s22_s19, [#allocation4], %s1284_s28, %s1284_s28, %s1285_s29  }
  0x12   :  { %s1286_s7 = smov [#allocation5]   ;;  %s1257_s11 = scalar_lea.hbm %s1459_s3, 22528 }
  0x13   :  { %s33_s8 = sshll.u32 %s1286_s7, 4  ;;  %p1258_p8 = scmp.ne.s32.totalorder %s1459_s3, %s1257_s11  ;;  %s34_s8 = int_to_ptr.vmem [resolvable:$true] %s33_s8 }
  0x14   :  { %p1261_p9 = scmp.lt.u32.totalorder %s1257_s11, %s1459_s3 }
  0x16   :  { %p1263_p10 = pnand %p1261_p9, %p1258_p8 }
  0x18   :  { %1266 = shalt.err (!%p1263_p10)
}
  0x19   :  { %s1267_s16 = scalar_lea.vmem %s34_s8, 22528  ;;  %p1272_p12 = scmp.lt.s32.totalorder %s34_s8, %s34_s8 }
  0x1a   :  { %p1268_p11 = scmp.ne.s32.totalorder %s34_s8, %s1267_s16  ;;  %p1273_p13 = scmp.lt.s32.totalorder %s1267_s16, %s1267_s16 }
  0x1c   :  { %p1274_p0 = por %p1273_p13, %p1272_p12 }
  0x1e   :  { %p1275_p1 = pnand %p1274_p0, %p1268_p11 }
  0x20   :  { %1278 = shalt.err (!%p1275_p1)
}
  0x21   :  { %s1287_s2 = smov 1408   ;;  %s1288_s17 = smov 88  }
  0x22   :  { %39 = dma.hbm_to_vmem [thread:$0]  %s1459_s3, 22528, %s34_s8, [#allocation6], %s1287_s2, %s1287_s2, %s1288_s17  }
  0x23   :  { %1279 = dma.done.wait [#allocation4], 1024  }
  0x24   :  { %1280 = vsyncadd [#allocation4], 4294966272 }
  0x25   :  { %1281 = dma.done.wait [#allocation6], 22528  }
  0x26   :  { %1282 = vsyncadd [#allocation6], 4294944768  ;;  %v1289_v0 = vmov 0   ;;  %v1290_v1 = vmov 0.0   ;;  %v57_v2 = vld [vmem:[%s1456_s0] sm:$0xff]  ;;  %v186_v4 = vld [vmem:[#allocation5 + $0x70] sm:$0xff] }
  0x27   :  { %1211 = vset.pattern.permute.xlu0 %v1289_v0  ;;  %52 = vst [vmem:[#allocation2] sm:$0xff] %v1290_v1  ;;  %331 = vmatprep.mubr.f32.mxu1 %v1290_v1  ;;  %v182_v3 = vld [vmem:[#allocation5 + $0x18] sm:$0xff]  ;;  %v67_v6 = vld [vmem:[#allocation5 + $0x8] sm:$0xff]  ;;  %v69_v7 = vld [vmem:[#allocation5 + $0x60] sm:$0xff]  ;;  %vm54_vm0 = vcmask 261120   ;;  %vm1300_vm2 = vmmov 0  }
  0x28   :  { %174 = vmatprep.mubr.f32.mxu0 %v1290_v1  ;;  %1212 = vset.pattern.permute.xlu1 %v1289_v0  ;;  %v1043_v5 = vpack.c.bf16 %v186_v4, %v182_v3  ;;  %v181_v8 = vld [vmem:[#allocation5 + $0x10] sm:$0xff]  ;;  %v1011_v9 = vpack.c.bf16 %v69_v7, %v67_v6  ;;  %v185_v10 = vld [vmem:[#allocation5 + $0x68] sm:$0xff]  ;;  %v66_v11 = vld [vmem:[#allocation5] sm:$0xff] }
  0x29   :  { %61 = vperm.xlu0 %1211, %v57_v2   ;;  %v68_v12 = vld [vmem:[#allocation5 + $0x58] sm:$0xff]  ;;  %v1045_v13 = vpack.c.bf16 %v185_v10, %v181_v8  ;;  %v190_v15 = vld [vmem:[#allocation5 + $0xc8] sm:$0xff]  ;;  %v194_v16 = vld [vmem:[#allocation5 + $0x120] sm:$0xff] }
  0x2a   :  { %1044 = vmatprep.subr.bf16.mxu1 %v1043_v5  ;;  %v1013_v14 = vpack.c.bf16 %v68_v12, %v66_v11  ;;  %v71_v17 = vld [vmem:[#allocation5 + $0xb8] sm:$0xff]  ;;  %1012 = vmatprep.subr.bf16.mxu0 %v1011_v9  ;;  %v1047_v18 = vpack.c.bf16 %v194_v16, %v190_v15  ;;  %v73_v19 = vld [vmem:[#allocation5 + $0x110] sm:$0xff]  ;;  %v189_v20 = vld [vmem:[#allocation5 + $0xc0] sm:$0xff] }
  0x2b   :  { %v193_v21 = vld [vmem:[#allocation5 + $0x118] sm:$0xff]  ;;  %1046 = vmatpush1.bf16.msra.mxu1 %v1045_v13  ;;  %v1015_v22 = vpack.c.bf16 %v73_v19, %v71_v17  ;;  %v70_v24 = vld [vmem:[#allocation5 + $0xb0] sm:$0xff]  ;;  %v72_v25 = vld [vmem:[#allocation5 + $0x108] sm:$0xff] }
  0x2c   :  { %1014 = vmatpush1.bf16.msra.mxu0 %v1013_v14  ;;  %v1049_v23 = vpack.c.bf16 %v193_v21, %v189_v20  ;;  %v198_v26 = vld [vmem:[#allocation5 + $0x178] sm:$0xff]  ;;  %1048 = vmatprep.subr.bf16.mxu1 %v1047_v18  ;;  %v1017_v27 = vpack.c.bf16 %v72_v25, %v70_v24  ;;  %v202_v28 = vld [vmem:[#allocation5 + $0x1d0] sm:$0xff]  ;;  %v75_v29 = vld [vmem:[#allocation5 + $0x168] sm:$0xff] }
  0x2d   :  { %v77_v30 = vld [vmem:[#allocation5 + $0x1c0] sm:$0xff]  ;;  %1016 = vmatprep.subr.bf16.mxu0 %v1015_v22  ;;  %v1051_v31 = vpack.c.bf16 %v202_v28, %v198_v26  ;;  %v197_v33 = vld [vmem:[#allocation5 + $0x170] sm:$0xff]  ;;  %v201_v34 = vld [vmem:[#allocation5 + $0x1c8] sm:$0xff] }
  0x2e   :  { %v1019_v32 = vpack.c.bf16 %v77_v30, %v75_v29  ;;  %v74_v35 = vld [vmem:[#allocation5 + $0x160] sm:$0xff]  ;;  %v76_v36 = vld [vmem:[#allocation5 + $0x1b8] sm:$0xff]  ;;  %v206_v37 = vld [vmem:[#allocation5 + $0x228] sm:$0xff]  ;;  %v1053_v39 = vpack.c.bf16 %v201_v34, %v197_v33 }
  0x2f   :  { %v210_v38 = vld [vmem:[#allocation5 + $0x280] sm:$0xff]  ;;  %1050 = vmatpush1.bf16.msra.mxu1 %v1049_v23  ;;  %v1021_v40 = vpack.c.bf16 %v76_v36, %v74_v35  ;;  %v79_v41 = vld [vmem:[#allocation5 + $0x218] sm:$0xff]  ;;  %v81_v42 = vld [vmem:[#allocation5 + $0x270] sm:$0xff] }
  0x30   :  { %1018 = vmatpush1.bf16.msra.mxu0 %v1017_v27  ;;  %v205_v43 = vld [vmem:[#allocation5 + $0x220] sm:$0xff]  ;;  %1052 = vmatprep.subr.bf16.mxu1 %v1051_v31  ;;  %v1055_v44 = vpack.c.bf16 %v210_v38, %v206_v37  ;;  %v1023_v45 = vpack.c.bf16 %v81_v42, %v79_v41  ;;  %v209_v46 = vld [vmem:[#allocation5 + $0x278] sm:$0xff]  ;;  %v78_v47 = vld [vmem:[#allocation5 + $0x210] sm:$0xff]  ;;  %v58_v38 = vlaneseq  ;;  %v1291_v41 = vmov 1.0  }
  0x31   :  { %1020 = vmatprep.subr.bf16.mxu0 %v1019_v32  ;;  %v80_v48 = vld [vmem:[#allocation5 + $0x268] sm:$0xff]  ;;  %v214_v49 = vld [vmem:[#allocation5 + $0x2d8] sm:$0xff]  ;;  %v218_v50 = vld [vmem:[#allocation5 + $0x330] sm:$0xff]  ;;  %v1057_v53 = vpack.c.bf16 %v209_v46, %v205_v43 }
  0x32   :  { %v83_v51 = vld [vmem:[#allocation5 + $0x2c8] sm:$0xff]  ;;  %v85_v52 = vld [vmem:[#allocation5 + $0x320] sm:$0xff]  ;;  %v1025_v54 = vpack.c.bf16 %v80_v48, %v78_v47  ;;  %v213_v55 = vld [vmem:[#allocation5 + $0x2d0] sm:$0xff]  ;;  %v1059_v57 = vpack.c.bf16 %v218_v50, %v214_v49 }
  0x33   :  { %1054 = vmatpush1.bf16.msra.mxu1 %v1053_v39  ;;  %v217_v56 = vld [vmem:[#allocation5 + $0x328] sm:$0xff]  ;;  %v1027_v58 = vpack.c.bf16 %v85_v52, %v83_v51  ;;  %v82_v59 = vld [vmem:[#allocation5 + $0x2c0] sm:$0xff]  ;;  %v84_v60 = vld [vmem:[#allocation5 + $0x318] sm:$0xff]  ;;  %v59_v39 = vand.u32 127, %v58_v38 }
  0x34   :  { %1022 = vmatpush1.bf16.msra.mxu0 %v1021_v40  ;;  %1056 = vmatprep.subr.bf16.mxu1 %v1055_v44  ;;  %v222_v61 = vld [vmem:[#allocation5 + $0x388] sm:$0xff]  ;;  %v226_v62 = vld [vmem:[#allocation5 + $0x3e0] sm:$0xff]  ;;  %v87_v63 = vld [vmem:[#allocation5 + $0x378] sm:$0xff]  ;;  %v1061_v2 = vpack.c.bf16 %v217_v56, %v213_v55  ;;  %v1029_v3 = vpack.c.bf16 %v84_v60, %v82_v59  ;;  %v1371_v44 = vshrl.u32 %v58_v38, 7  ;;  %v1292_v59 = vmov 5  }
  0x35   :  { %1024 = vmatprep.subr.bf16.mxu0 %v1023_v45  ;;  %v89_v0 = vld [vmem:[#allocation5 + $0x3d0] sm:$0xff]  ;;  %v221_v4 = vld [vmem:[#allocation5 + $0x380] sm:$0xff]  ;;  %v225_v5 = vld [vmem:[#allocation5 + $0x3d8] sm:$0xff]  ;;  %v1063_v6 = vpack.c.bf16 %v226_v62, %v222_v61  ;;  %1217 = vset.pattern.permute.xlu0 %v1292_v59 }
  0x36   :  { %v1031_v7 = vpack.c.bf16 %v89_v0, %v87_v63  ;;  %v86_v8 = vld [vmem:[#allocation5 + $0x370] sm:$0xff]  ;;  %v88_v9 = vld [vmem:[#allocation5 + $0x3c8] sm:$0xff]  ;;  %v230_v10 = vld [vmem:[#allocation5 + $0x438] sm:$0xff]  ;;  %v1065_v14 = vpack.c.bf16 %v225_v5, %v221_v4  ;;  %v1374_v45 = vsub.s32 0, %v1371_v44  ;;  %v1293_v63 = vmov 1  }
  0x37   :  { %1058 = vmatpush1.bf16.msra.mxu1 %v1057_v53  ;;  %v234_v11 = vld [vmem:[#allocation5 + $0x490] sm:$0xff]  ;;  %v91_v12 = vld [vmem:[#allocation5 + $0x428] sm:$0xff]  ;;  %v93_v13 = vld [vmem:[#allocation5 + $0x480] sm:$0xff]  ;;  %v1033_v15 = vpack.c.bf16 %v88_v9, %v86_v8  ;;  %v1294_v0 = vmov 7   ;;  %v1297_v4 = vmov 4   ;;  %v1298_v5 = vmov 6  }
  0x38   :  { %1026 = vmatpush1.bf16.msra.mxu0 %v1025_v54  ;;  %1060 = vmatprep.subr.bf16.mxu1 %v1059_v57  ;;  %v229_v16 = vld [vmem:[#allocation5 + $0x430] sm:$0xff]  ;;  %v233_v17 = vld [vmem:[#allocation5 + $0x488] sm:$0xff]  ;;  %v53_v18 = vld [vmem:[%s1457_s1] sm:$0xff]  ;;  %v1067_v19 = vpack.c.bf16 %v234_v11, %v230_v10  ;;  %v1035_v20 = vpack.c.bf16 %v93_v13, %v91_v12  ;;  %v1299_v9 = vmov 0.0|0.0  }
  0x39   :  { %1028 = vmatprep.subr.bf16.mxu0 %v1027_v58  ;;  %v90_v21 = vld [vmem:[#allocation5 + $0x420] sm:$0xff]  ;;  %v92_v22 = vld [vmem:[#allocation5 + $0x478] sm:$0xff]  ;;  %v238_v23 = vld [vmem:[#allocation5 + $0x4e8] sm:$0xff]  ;;  %55 = vst.msk [vmem:[#allocation2] sm:$0xff] %vm54_vm0, %v53_v18  ;;  %v1069_v27 = vpack.c.bf16 %v233_v17, %v229_v16 }
  0x3a   :  { %v242_v24 = vld [vmem:[#allocation5 + $0x540] sm:$0xff]  ;;  %v95_v25 = vld [vmem:[#allocation5 + $0x4d8] sm:$0xff]  ;;  %v97_v26 = vld [vmem:[#allocation5 + $0x530] sm:$0xff]  ;;  %v1037_v28 = vpack.c.bf16 %v92_v22, %v90_v21 }
  0x3b   :  { %1062 = vmatpush1.bf16.msra.mxu1 %v1061_v2  ;;  %v237_v29 = vld [vmem:[#allocation5 + $0x4e0] sm:$0xff]  ;;  %v1071_v30 = vpack.c.bf16 %v242_v24, %v238_v23  ;;  %v1039_v31 = vpack.c.bf16 %v97_v26, %v95_v25  ;;  %v241_v32 = vld [vmem:[#allocation5 + $0x538] sm:$0xff]  ;;  %v94_v33 = vld [vmem:[#allocation5 + $0x4d0] sm:$0xff]  ;;  %v1295_v2 = vmov 2  }
  0x3c   :  { %1030 = vmatpush1.bf16.msra.mxu0 %v1029_v3  ;;  %1064 = vmatprep.subr.bf16.mxu1 %v1063_v6  ;;  %v96_v34 = vld [vmem:[#allocation5 + $0x528] sm:$0xff]  ;;  %v1073_v35 = vpack.c.bf16 %v241_v32, %v237_v29  ;;  %v1379_v46 = vld [vmem:[%s1460_s4 + $0x2] sm:$0xf]  ;;  %v1384_v47 = vld [vmem:[%s1460_s4] sm:$0x3]  ;;  %v1296_v3 = vmov 3  }
  0x3d   :  { %1032 = vmatprep.subr.bf16.mxu0 %v1031_v7  ;;  %v1041_v36 = vpack.c.bf16 %v96_v34, %v94_v33  ;;  %v250_v48 = vrot.slane %v1379_v46, %v1374_v45  ;;  %v103_v49 = vrot.slane %v1384_v47, %v1374_v45  ;;  %v475_v6 = vld [vmem:[#allocation5 + $0x30] sm:$0xff]  ;;  %v476_v7 = vld [vmem:[#allocation5 + $0x88] sm:$0xff]  ;;  %v477_v10 = vld [vmem:[#allocation5 + $0xe0] sm:$0xff] }
  0x3e   :  { %v1108_v8 = vpack.c.bf16 %v476_v7, %v475_v6  ;;  %v478_v11 = vld [vmem:[#allocation5 + $0x138] sm:$0xff]  ;;  %v184_v13 = vld [vmem:[#allocation5 + $0x28] sm:$0xff]  ;;  %v191_v22 = vld [vmem:[#allocation5 + $0xd0] sm:$0xff] }
  0x3f   :  { %1066 = vmatpush1.bf16.msra.mxu1 %v1065_v14  ;;  %v1111_v12 = vpack.c.bf16 %v478_v11, %v477_v10  ;;  %v188_v14 = vld [vmem:[#allocation5 + $0x80] sm:$0xff]  ;;  %v187_v17 = vld [vmem:[#allocation5 + $0x78] sm:$0xff]  ;;  %v195_v23 = vld [vmem:[#allocation5 + $0x128] sm:$0xff] }
  0x40   :  { %1034 = vmatpush1.bf16.msra.mxu0 %v1033_v15  ;;  %1068 = vmatprep.subr.bf16.mxu1 %v1067_v19  ;;  %v1365_v37 = vld [vmem:[#allocation2] sm:$0xff]  ;;  %v183_v15 = vld [vmem:[#allocation5 + $0x20] sm:$0xff]  ;;  %v1075_v16 = vpack.c.bf16 %v188_v14, %v184_v13  ;;  %v196_v19 = vld [vmem:[#allocation5 + $0x130] sm:$0xff]  ;;  %v1081_v26 = vpack.c.bf16 %v195_v23, %v191_v22 }
  0x41   :  { %1036 = vmatprep.subr.bf16.mxu0 %v1035_v20  ;;  %v192_v18 = vld [vmem:[#allocation5 + $0xd8] sm:$0xff]  ;;  %v1077_v20 = vpack.c.bf16 %v187_v17, %v183_v15  ;;  %v200_v24 = vld [vmem:[#allocation5 + $0x188] sm:$0xff]  ;;  %v204_v25 = vld [vmem:[#allocation5 + $0x1e0] sm:$0xff] }
  0x42   :  { %v1079_v21 = vpack.c.bf16 %v196_v19, %v192_v18  ;;  %v203_v29 = vld [vmem:[#allocation5 + $0x1d8] sm:$0xff]  ;;  %v207_v34 = vld [vmem:[#allocation5 + $0x230] sm:$0xff]  ;;  %v220_v38 = vld [vmem:[#allocation5 + $0x340] sm:$0xff] }
  0x43   :  { %1070 = vmatpush1.bf16.msra.mxu1 %v1069_v27  ;;  %v1083_v27 = vpack.c.bf16 %v204_v25, %v200_v24  ;;  %v236_v59 = vld [vmem:[#allocation5 + $0x4a0] sm:$0xff]  ;;  %v243_v6 = vld [vmem:[#allocation5 + $0x548] sm:$0xff]  ;;  %v566_v13 = vld [vmem:[#allocation5 + $0x150] sm:$0xff] }
  0x44   :  { %1038 = vmatpush1.bf16.msra.mxu0 %v1037_v28  ;;  %1072 = vmatprep.subr.bf16.mxu1 %v1071_v30  ;;  %v199_v28 = vld [vmem:[#allocation5 + $0x180] sm:$0xff]  ;;  %v208_v30 = vld [vmem:[#allocation5 + $0x238] sm:$0xff]  ;;  %v569_v15 = vld [vmem:[#allocation5 + $0x1a8] sm:$0xff] }
  0x45   :  { %1040 = vmatprep.subr.bf16.mxu0 %v1039_v31  ;;  %v212_v31 = vld [vmem:[#allocation5 + $0x290] sm:$0xff]  ;;  %v1085_v32 = vpack.c.bf16 %v203_v29, %v199_v28  ;;  %v560_v10 = vld [vmem:[#allocation5 + $0xa0] sm:$0xff]  ;;  %v575_v18 = vld [vmem:[#allocation5 + $0x258] sm:$0xff] }
  0x46   :  { %v1087_v33 = vpack.c.bf16 %v212_v31, %v208_v30  ;;  %v578_v19 = vld [vmem:[#allocation5 + $0x2b0] sm:$0xff]  ;;  %v584_v22 = vld [vmem:[#allocation5 + $0x360] sm:$0xff]  ;;  %v587_v24 = vld [vmem:[#allocation5 + $0x3b8] sm:$0xff] }
  0x47   :  { %1074 = vmatpush1.bf16.msra.mxu1 %v1073_v35  ;;  %v211_v35 = vld [vmem:[#allocation5 + $0x288] sm:$0xff]  ;;  %v590_v25 = vld [vmem:[#allocation5 + $0x410] sm:$0xff]  ;;  %v596_v28 = vld [vmem:[#allocation5 + $0x4c0] sm:$0xff] }
  0x48   :  { %1042 = vmatpush1.bf16.msra.mxu0 %v1041_v36  ;;  %1107 = vmatprep.subr.bf16.mxu1 %v1299_v9  ;;  %v216_v36 = vld [vmem:[#allocation5 + $0x2e8] sm:$0xff] }
  0x49   :  { %1076 = vmatprep.subr.bf16.mxu0 %v1075_v16  ;;  %v572_v16 = vld [vmem:[#allocation5 + $0x200] sm:$0xff] }
  0x4a   :  { %332 = vmatmul.mubr.f32.vlgmr.msra.gmra.mrb[0].mxu1 %v1365_v37  ;;  %v1152_v17 = vpack.c.bf16 %v572_v16, %v569_v15  ;;  %v571_v15 = vld [vmem:[#allocation5 + $0x1f8] sm:$0xff] }
  0x4b   :  { %1109 = vmatpush3.bf16.msra.mxu1 %v1108_v8  ;;  %938 = vmatprep.mubr.msk.f32.mxu1 %vm1300_vm2, %v1290_v1  ;;  %v557_v8 = vld [vmem:[#allocation5 + $0x48] sm:$0xff] }
  0x4c   :  { %1110 = vmatprep.subr.bf16.mxu1 %v1299_v9  ;;  %v1146_v11 = vpack.c.bf16 %v560_v10, %v557_v8 }
  0x4f   :  { %1112 = vmatpush3.bf16.msra.mxu1 %v1111_v12  ;;  %v563_v12 = vld [vmem:[#allocation5 + $0xf8] sm:$0xff] }
  0x50   :  { %v1149_v14 = vpack.c.bf16 %v566_v13, %v563_v12  ;;  %v561_v12 = vld [vmem:[#allocation5 + $0xe8] sm:$0xff]  ;;  %v564_v13 = vld [vmem:[#allocation5 + $0x140] sm:$0xff] }
  0x51   :  { %v1119_v16 = vpack.c.bf16 %v564_v13, %v561_v12  ;;  %v786_v12 = vld [vmem:[#allocation5 + $0x158] sm:$0xff]  ;;  %v788_v13 = vld [vmem:[#allocation5 + $0x208] sm:$0xff] }
  0xa8   :  { %v62_v40 = vpop.permute.xlu0 %61 }
  0xa9   :  { %vm63_vm1 = vcmp.eq.s32.totalorder %v62_v40, %v59_v39  ;;  %v556_v39 = vld [vmem:[#allocation5 + $0x40] sm:$0xff]  ;;  %v559_v40 = vld [vmem:[#allocation5 + $0x98] sm:$0xff] }
  0xaa   :  { %886 = vmatmul.mubr.msk.f32.vlgmr.msra.gmra.mrb[0].mxu0 %vm63_vm1, %v1291_v41  ;;  %v1089_v41 = vpack.c.bf16 %v211_v35, %v207_v34  ;;  %v419_v34 = vld [vmem:[#allocation3] sm:$0xff]  ;;  %v421_v35 = vld [vmem:[#allocation3 + $0x10] sm:$0xff] }
  0xab   :  { %402 = vmatprep.mubr.f32.mxu0 %v1290_v1  ;;  %1078 = vmatpush1.bf16.msra.mxu0 %v1077_v20  ;;  %v1155_v20 = vpack.c.bf16 %v578_v19, %v575_v18  ;;  %v567_v18 = vld [vmem:[#allocation5 + $0x198] sm:$0xff]  ;;  %v570_v19 = vld [vmem:[#allocation5 + $0x1f0] sm:$0xff] }
  0xac   :  { %1080 = vmatprep.subr.bf16.mxu0 %v1079_v21  ;;  %v581_v21 = vld [vmem:[#allocation5 + $0x308] sm:$0xff] }
  0xad   :  { %v1158_v23 = vpack.c.bf16 %v584_v22, %v581_v21  ;;  %v577_v21 = vld [vmem:[#allocation5 + $0x2a8] sm:$0xff]  ;;  %v1123_v22 = vpack.c.bf16 %v570_v19, %v567_v18 }
  0xae   :  { %v792_v18 = vld [vmem:[#allocation5 + $0x368] sm:$0xff] }
  0xaf   :  { %1082 = vmatpush1.bf16.msra.mxu0 %v1081_v26  ;;  %v1161_v26 = vpack.c.bf16 %v590_v25, %v587_v24  ;;  %v573_v24 = vld [vmem:[#allocation5 + $0x248] sm:$0xff]  ;;  %v576_v25 = vld [vmem:[#allocation5 + $0x2a0] sm:$0xff] }
  0xb0   :  { %1084 = vmatprep.subr.bf16.mxu0 %v1083_v27  ;;  %v593_v27 = vld [vmem:[#allocation5 + $0x468] sm:$0xff] }
  0xb1   :  { %v1164_v29 = vpack.c.bf16 %v596_v28, %v593_v27  ;;  %v583_v27 = vld [vmem:[#allocation5 + $0x358] sm:$0xff]  ;;  %v1127_v28 = vpack.c.bf16 %v576_v25, %v573_v24  ;;  %v796_v24 = vld [vmem:[#allocation5 + $0x4c8] sm:$0xff] }
  0xb3   :  { %1086 = vmatpush1.bf16.msra.mxu0 %v1085_v32  ;;  %v420_v32 = vld [vmem:[#allocation3 + $0x8] sm:$0xff] }
  0xb4   :  { %1088 = vmatprep.subr.bf16.mxu0 %v1087_v33 }
  0xb7   :  { %1090 = vmatpush1.bf16.msra.mxu0 %v1089_v41 }
 0x11d   :  { %v333_v42 = vpop.f32.mrb[0].mxu1 }
 0x11e   :  { %v1369_v43 = vpop.f32.mrb[1].mxu1  ;;  %v334_v50 = vadd.f32 %v333_v42, %v250_v48  ;;  %v1113_v42 = vpack.c.bf16 %v559_v40, %v556_v39  ;;  %v1091_v48 = vpack.c.bf16 %v220_v38, %v216_v36  ;;  %v422_v38 = vld [vmem:[#allocation3 + $0x18] sm:$0xff] }
 0x120   :  { %1114 = vmatprep.subr.bf16.mxu1 %v1113_v42  ;;  %1092 = vmatprep.subr.bf16.mxu0 %v1091_v48 }
 0x17d   :  { %v176_v51 = vpop.f32.mrb[0].mxu0 }
 0x17e   :  { %v177_v52 = vadd.f32 %v176_v51, %v103_v49  ;;  %v1390_v53 = vpop.f32.mrb[1].mxu0  ;;  %v215_v49 = vld [vmem:[#allocation5 + $0x2e0] sm:$0xff]  ;;  %v224_v51 = vld [vmem:[#allocation5 + $0x398] sm:$0xff] }
 0x180   :  { %v409_v54 = vadd.f32 %v334_v50, %v177_v52  ;;  %v219_v50 = vld [vmem:[#allocation5 + $0x338] sm:$0xff]  ;;  %v228_v52 = vld [vmem:[#allocation5 + $0x3f0] sm:$0xff] }
 0x182   :  { %410 = vmax.xlane.f32.xlu0 %v409_v54 }
 0x20f   :  { %v411_v55 = vpop.xlane.xlu0 %410 }
 0x210   :  { %v412_v56 = vsub.f32 %v409_v54, %v411_v55  ;;  %v1093_v54 = vpack.c.bf16 %v219_v50, %v215_v49  ;;  %v1095_v55 = vpack.c.bf16 %v228_v52, %v224_v51  ;;  %v423_v49 = vld [vmem:[#allocation3 + $0x20] sm:$0xff] }
 0x212   :  { %v413_v57 = vmul.f32 1.442695, %v412_v56  ;;  %v223_v56 = vld [vmem:[#allocation5 + $0x390] sm:$0xff]  ;;  %1094 = vmatpush1.bf16.msra.mxu0 %v1093_v54 }
 0x213   :  { %1096 = vmatprep.subr.bf16.mxu0 %v1095_v55  ;;  %v424_v55 = vld [vmem:[#allocation3 + $0x28] sm:$0xff] }
 0x214   :  { %1221 = vpow2.f32 %v413_v57  ;;  %v227_v57 = vld [vmem:[#allocation5 + $0x3e8] sm:$0xff] }
 0x21e   :  { %v1222_v58 = vpop.eup %1221 }
 0x21f   :  { %415 = vadd.xlane.f32.xlu1 %v1222_v58 }
 0x2ac   :  { %v416_v60 = vpop.xlane.xlu1 %415 }
 0x2ad   :  { %1223 = vrcp.f32 %v416_v60  ;;  %v1097_v60 = vpack.c.bf16 %v227_v57, %v223_v56 }
 0x2af   :  { %1098 = vmatpush1.bf16.msra.mxu0 %v1097_v60 }
 0x2b7   :  { %v1224_v61 = vpop.eup %1223 }
 0x2b8   :  { %v418_v62 = vmul.f32 %v1224_v61, %v1222_v58  ;;  %v232_v58 = vld [vmem:[#allocation5 + $0x448] sm:$0xff] }
 0x2b9   :  { %v1099_v61 = vpack.c.bf16 %v236_v59, %v232_v58  ;;  %v425_v58 = vld [vmem:[#allocation3 + $0x30] sm:$0xff] }
 0x2ba   :  { %878 = vst [vmem:[%s1461_s5 + $0x10] sm:$0xff] %v418_v62  ;;  %458 = vperm.xlu0 %1217, %v418_v62   ;;  %429 = vperm.xlu1 %1212, %v418_v62  }
 0x2bb   :  { %1100 = vmatprep.subr.bf16.mxu0 %v1099_v61 }
 0x2be   :  { %1213 = vset.pattern.permute.xlu1 %v1293_v63  ;;  %1220 = vset.pattern.permute.xlu0 %v1294_v0  ;;  %v235_v63 = vld [vmem:[#allocation5 + $0x498] sm:$0xff] }
 0x2bf   :  { %434 = vperm.xlu1 %1213, %v418_v62  }
 0x2c3   :  { %1214 = vset.pattern.permute.xlu1 %v1295_v2  ;;  %v244_v2 = vld [vmem:[#allocation5 + $0x550] sm:$0xff] }
 0x2c4   :  { %440 = vperm.xlu1 %1214, %v418_v62  }
 0x2c8   :  { %1215 = vset.pattern.permute.xlu1 %v1296_v3 }
 0x2c9   :  { %446 = vperm.xlu1 %1215, %v418_v62  }
 0x2cd   :  { %1216 = vset.pattern.permute.xlu1 %v1297_v4 }
 0x2ce   :  { %452 = vperm.xlu1 %1216, %v418_v62  }
 0x2d2   :  { %1218 = vset.pattern.permute.xlu1 %v1298_v5  ;;  %v239_v5 = vld [vmem:[#allocation5 + $0x4f0] sm:$0xff] }
 0x2d3   :  { %464 = vperm.xlu1 %1218, %v418_v62   ;;  %v1105_v7 = vpack.c.bf16 %v243_v6, %v239_v5  ;;  %v565_v5 = vld [vmem:[#allocation5 + $0x148] sm:$0xff] }
 0x2d7   :  { %1219 = vset.pattern.permute.xlu1 %v1294_v0  ;;  %v240_v0 = vld [vmem:[#allocation5 + $0x4f8] sm:$0xff] }
 0x2d8   :  { %470 = vperm.xlu1 %1219, %v418_v62   ;;  %v231_v62 = vld [vmem:[#allocation5 + $0x440] sm:$0xff]  ;;  %v1103_v4 = vpack.c.bf16 %v244_v2, %v240_v0  ;;  %v555_v0 = vld [vmem:[#allocation5 + $0x38] sm:$0xff]  ;;  %v558_v2 = vld [vmem:[#allocation5 + $0x90] sm:$0xff] }
 0x2d9   :  { %v1101_v3 = vpack.c.bf16 %v235_v63, %v231_v62  ;;  %v426_v63 = vld [vmem:[#allocation3 + $0x38] sm:$0xff]  ;;  %v1115_v8 = vpack.c.bf16 %v558_v2, %v555_v0 }
 0x2db   :  { %1102 = vmatpush1.bf16.msra.mxu0 %v1101_v3 }
 0x2dc   :  { %1104 = vmatprep.subr.bf16.mxu0 %v1103_v4  ;;  %v562_v4 = vld [vmem:[#allocation5 + $0xf0] sm:$0xff] }
 0x2df   :  { %1106 = vmatpush1.bf16.msra.mxu0 %v1105_v7 }
 0x2e0   :  { %1145 = vmatprep.subr.bf16.mxu0 %v1299_v9 }
 0x2e2   :  { %403 = vmatmul.mubr.f32.vlgmr.msra.gmra.mrb[2].mxu0 %v1365_v37 }
 0x2e3   :  { %1147 = vmatpush3.bf16.msra.mxu0 %v1146_v11  ;;  %973 = vmatprep.mubr.msk.f32.mxu0 %vm1300_vm2, %v1290_v1  ;;  %v1117_v11 = vpack.c.bf16 %v565_v5, %v562_v4 }
 0x2e4   :  { %1148 = vmatprep.subr.bf16.mxu0 %v1299_v9 }
 0x2e7   :  { %1150 = vmatpush3.bf16.msra.mxu0 %v1149_v14  ;;  %v568_v14 = vld [vmem:[#allocation5 + $0x1a0] sm:$0xff] }
 0x2e8   :  { %1151 = vmatprep.subr.bf16.mxu0 %v1299_v9 }
 0x2eb   :  { %1153 = vmatpush3.bf16.msra.mxu0 %v1152_v17  ;;  %v1121_v17 = vpack.c.bf16 %v571_v15, %v568_v14  ;;  %v789_v15 = vld [vmem:[#allocation5 + $0x260] sm:$0xff] }
 0x2ec   :  { %1154 = vmatprep.subr.bf16.mxu0 %v1299_v9 }
 0x2ef   :  { %1156 = vmatpush3.bf16.msra.mxu0 %v1155_v20  ;;  %v574_v20 = vld [vmem:[#allocation5 + $0x250] sm:$0xff] }
 0x2f0   :  { %1157 = vmatprep.subr.bf16.mxu0 %v1299_v9 }
 0x2f3   :  { %1159 = vmatpush3.bf16.msra.mxu0 %v1158_v23  ;;  %v1125_v23 = vpack.c.bf16 %v577_v21, %v574_v20  ;;  %v793_v20 = vld [vmem:[#allocation5 + $0x3c0] sm:$0xff]  ;;  %v794_v21 = vld [vmem:[#allocation5 + $0x418] sm:$0xff] }
 0x2f4   :  { %1160 = vmatprep.subr.bf16.mxu0 %v1299_v9 }
 0x2f7   :  { %1162 = vmatpush3.bf16.msra.mxu0 %v1161_v26  ;;  %v580_v26 = vld [vmem:[#allocation5 + $0x300] sm:$0xff] }
 0x2f8   :  { %1163 = vmatprep.subr.bf16.mxu0 %v1299_v9 }
 0x2fb   :  { %1165 = vmatpush3.bf16.msra.mxu0 %v1164_v29  ;;  %v1129_v29 = vpack.c.bf16 %v583_v27, %v580_v26  ;;  %v797_v26 = vld [vmem:[#allocation5 + $0x520] sm:$0xff]  ;;  %v798_v27 = vld [vmem:[#allocation5 + $0x578] sm:$0xff] }
 0x2fc   :  { %1166 = vmatprep.subr.bf16.mxu0 %v1299_v9 }
 0x339   :  { %v430_v30 = vpop.permute.xlu1 %429  ;;  %v459_v56 = vpop.permute.xlu0 %458 }
 0x33a   :  { %v432_v39 = vmul.f32 %v430_v30, %v419_v34  ;;  %v461_v59 = vmul.f32 %v459_v56, %v424_v55  ;;  %v579_v30 = vld [vmem:[#allocation5 + $0x2f8] sm:$0xff]  ;;  %v597_v55 = vld [vmem:[#allocation5 + $0x508] sm:$0xff]  ;;  %v600_v56 = vld [vmem:[#allocation5 + $0x560] sm:$0xff] }
 0x33e   :  { %v435_v31 = vpop.permute.xlu1 %434 }
 0x33f   :  { %v437_v36 = vmul.f32 %v435_v31, %v420_v32  ;;  %v582_v31 = vld [vmem:[#allocation5 + $0x350] sm:$0xff] }
 0x340   :  { %v586_v32 = vld [vmem:[#allocation5 + $0x3b0] sm:$0xff]  ;;  %v1131_v34 = vpack.c.bf16 %v582_v31, %v579_v30  ;;  %v603_v30 = vld [vmem:[%s1460_s4 + $0x7] sm:$0x7] }
 0x341   :  { %v438_v42 = vadd.f32 %v437_v36, %v432_v39  ;;  %v585_v36 = vld [vmem:[#allocation5 + $0x3a8] sm:$0xff]  ;;  %v592_v39 = vld [vmem:[#allocation5 + $0x460] sm:$0xff] }
 0x343   :  { %v441_v33 = vpop.permute.xlu1 %440 }
 0x344   :  { %v443_v40 = vmul.f32 %v441_v33, %v421_v35  ;;  %v589_v33 = vld [vmem:[#allocation5 + $0x408] sm:$0xff] }
 0x345   :  { %v1133_v35 = vpack.c.bf16 %v589_v33, %v586_v32  ;;  %v608_v32 = vrot.slane %v603_v30, %v1374_v45 }
 0x346   :  { %v444_v50 = vadd.f32 %v443_v40, %v438_v42  ;;  %v595_v40 = vld [vmem:[#allocation5 + $0x4b8] sm:$0xff] }
 0x347   :  { %v1137_v42 = vpack.c.bf16 %v595_v40, %v592_v39 }
 0x348   :  { %v447_v41 = vpop.permute.xlu1 %446 }
 0x349   :  { %v449_v48 = vmul.f32 %v447_v41, %v422_v38  ;;  %v588_v38 = vld [vmem:[#allocation5 + $0x400] sm:$0xff] }
 0x34a   :  { %v1135_v41 = vpack.c.bf16 %v588_v38, %v585_v36 }
 0x34b   :  { %v450_v52 = vadd.f32 %v449_v48, %v444_v50  ;;  %v591_v48 = vld [vmem:[#allocation5 + $0x458] sm:$0xff] }
 0x34d   :  { %v453_v51 = vpop.permute.xlu1 %452 }
 0x34e   :  { %v455_v54 = vmul.f32 %v453_v51, %v423_v49  ;;  %v594_v49 = vld [vmem:[#allocation5 + $0x4b0] sm:$0xff] }
 0x34f   :  { %v1139_v50 = vpack.c.bf16 %v594_v49, %v591_v48  ;;  %v598_v51 = vld [vmem:[#allocation5 + $0x510] sm:$0xff] }
 0x350   :  { %v456_v57 = vadd.f32 %v455_v54, %v450_v52  ;;  %v601_v52 = vld [vmem:[#allocation5 + $0x568] sm:$0xff] }
 0x351   :  { %v1141_v54 = vpack.c.bf16 %v601_v52, %v598_v51 }
 0x352   :  { %v465_v60 = vpop.permute.xlu1 %464  ;;  %v462_v61 = vadd.f32 %v461_v59, %v456_v57  ;;  %v599_v57 = vld [vmem:[#allocation5 + $0x518] sm:$0xff]  ;;  %v602_v59 = vld [vmem:[#allocation5 + $0x570] sm:$0xff] }
 0x353   :  { %v467_v62 = vmul.f32 %v465_v60, %v425_v58  ;;  %v1143_v58 = vpack.c.bf16 %v600_v56, %v597_v55  ;;  %v1167_v60 = vpack.c.bf16 %v602_v59, %v599_v57 }
 0x355   :  { %v468_v6 = vadd.f32 %v467_v62, %v462_v61  ;;  %1168 = vmatpush3.bf16.msra.mxu0 %v1167_v60 }
 0x357   :  { %v471_v3 = vpop.permute.xlu1 %470 }
 0x358   :  { %v473_v7 = vmul.f32 %v471_v3, %v426_v63  ;;  %v1418_v63 = vsub.s32 1, %v1371_v44 }
 0x35a   :  { %v474_v10 = vadd.f32 %v473_v7, %v468_v6  ;;  %v107_v0 = vrot.slane %v1384_v47, %v1418_v63  ;;  %v783_v7 = vld [vmem:[#allocation5 + $0x50] sm:$0xff]  ;;  %v254_v31 = vrot.slane %v1379_v46, %v1418_v63 }
 0x35c   :  { %939 = vmatmul.mubr.msk.f32.vlgmr.msra.gmra.mrb[2].mxu1 %vm54_vm0, %v474_v10  ;;  %v179_v2 = vadd.f32 %v1390_v53, %v107_v0  ;;  %v787_v53 = vld [vmem:[#allocation5 + $0x1b0] sm:$0xff] }
 0x35d   :  { %1116 = vmatpush1.bf16.msra.mxu1 %v1115_v8  ;;  %684 = vmatprep.mubr.f32.mxu1 %v1290_v1  ;;  %v784_v8 = vld [vmem:[#allocation5 + $0xa8] sm:$0xff]  ;;  %v1176_v14 = vpack.c.bf16 %v788_v13, %v787_v53 }
 0x35e   :  { %1118 = vmatprep.subr.bf16.mxu1 %v1117_v11  ;;  %v1170_v10 = vpack.c.bf16 %v784_v8, %v783_v7  ;;  %v785_v11 = vld [vmem:[#allocation5 + $0x100] sm:$0xff] }
 0x35f   :  { %v1173_v47 = vpack.c.bf16 %v786_v12, %v785_v11 }
 0x361   :  { %1120 = vmatpush1.bf16.msra.mxu1 %v1119_v16 }
 0x362   :  { %1122 = vmatprep.subr.bf16.mxu1 %v1121_v17  ;;  %v791_v17 = vld [vmem:[#allocation5 + $0x310] sm:$0xff] }
 0x363   :  { %v1182_v19 = vpack.c.bf16 %v792_v18, %v791_v17 }
 0x365   :  { %1124 = vmatpush1.bf16.msra.mxu1 %v1123_v22  ;;  %v1185_v22 = vpack.c.bf16 %v794_v21, %v793_v20 }
 0x366   :  { %1126 = vmatprep.subr.bf16.mxu1 %v1125_v23  ;;  %v795_v23 = vld [vmem:[#allocation5 + $0x470] sm:$0xff] }
 0x367   :  { %v1188_v25 = vpack.c.bf16 %v796_v24, %v795_v23 }
 0x369   :  { %1128 = vmatpush1.bf16.msra.mxu1 %v1127_v28  ;;  %v1191_v28 = vpack.c.bf16 %v798_v27, %v797_v26 }
 0x36a   :  { %1130 = vmatprep.subr.bf16.mxu1 %v1129_v29  ;;  %v257_v29 = vsub.s32 2, %v1371_v44 }
 0x36c   :  { %v258_v33 = vrot.slane %v1379_v46, %v257_v29  ;;  %v616_v56 = vrot.slane %v603_v30, %v257_v29 }
 0x36d   :  { %1132 = vmatpush1.bf16.msra.mxu1 %v1131_v34  ;;  %v612_v34 = vrot.slane %v603_v30, %v1418_v63 }
 0x36e   :  { %1134 = vmatprep.subr.bf16.mxu1 %v1133_v35 }
 0x371   :  { %1136 = vmatpush1.bf16.msra.mxu1 %v1135_v41 }
 0x372   :  { %1138 = vmatprep.subr.bf16.mxu1 %v1137_v42 }
 0x375   :  { %1140 = vmatpush1.bf16.msra.mxu1 %v1139_v50 }
 0x376   :  { %1142 = vmatprep.subr.bf16.mxu1 %v1141_v54  ;;  %v261_v54 = vsub.s32 3, %v1371_v44 }
 0x379   :  { %1144 = vmatpush1.bf16.msra.mxu1 %v1143_v58 }
 0x37a   :  { %1169 = vmatprep.subr.bf16.mxu1 %v1299_v9 }
 0x3b5   :  { %v1413_v61 = vpop.f32.mrb[2].mxu0 }
 0x3b6   :  { %v1415_v62 = vpop.f32.mrb[3].mxu0  ;;  %v405_v41 = vadd.f32 %v1413_v61, %v258_v33 }
 0x42f   :  { %v549_v3 = vpop.f32.mrb[2].mxu1 }
 0x430   :  { %v553_v4 = vadd.f32 %v549_v3, %v179_v2  ;;  %v940_v5 = vpop.f32.mrb[3].mxu1 }
 0x432   :  { %v554_v6 = vmax.f32 %v553_v4, 0.0 }
 0x434   :  { %685 = vmatmul.mubr.f32.vlgmr.msra.gmra.mrb[4].mxu1 %v554_v6  ;;  %974 = vmatmul.mubr.f32.vlgmr.msra.gmra.mrb[4].mxu0 %v554_v6 }
 0x435   :  { %1008 = vmatprep.mubr.msk.f32.mxu1 %vm1300_vm2, %v1290_v1  ;;  %1171 = vmatpush3.bf16.msra.mxu1 %v1170_v10  ;;  %v790_v1 = vld [vmem:[#allocation5 + $0x2b8] sm:$0xff] }
 0x436   :  { %1172 = vmatprep.subr.bf16.mxu1 %v1299_v9  ;;  %v1179_v16 = vpack.c.bf16 %v790_v1, %v789_v15 }
 0x439   :  { %1174 = vmatpush3.bf16.msra.mxu1 %v1173_v47 }
 0x43a   :  { %1175 = vmatprep.subr.bf16.mxu1 %v1299_v9 }
 0x43d   :  { %1177 = vmatpush3.bf16.msra.mxu1 %v1176_v14 }
 0x43e   :  { %1178 = vmatprep.subr.bf16.mxu1 %v1299_v9 }
 0x441   :  { %1180 = vmatpush3.bf16.msra.mxu1 %v1179_v16 }
 0x442   :  { %1181 = vmatprep.subr.bf16.mxu1 %v1299_v9 }
 0x445   :  { %1183 = vmatpush3.bf16.msra.mxu1 %v1182_v19 }
 0x446   :  { %1184 = vmatprep.subr.bf16.mxu1 %v1299_v9 }
 0x449   :  { %1186 = vmatpush3.bf16.msra.mxu1 %v1185_v22 }
 0x44a   :  { %1187 = vmatprep.subr.bf16.mxu1 %v1299_v9 }
 0x44d   :  { %1189 = vmatpush3.bf16.msra.mxu1 %v1188_v25 }
 0x44e   :  { %1190 = vmatprep.subr.bf16.mxu1 %v1299_v9  ;;  %v336_v9 = vadd.f32 %v1369_v43, %v254_v31  ;;  %v262_v43 = vrot.slane %v1379_v46, %v261_v54  ;;  %v890_v46 = vld [vmem:[%s1460_s4 + $0xa] ss:$0 sm:$0xff] }
 0x450   :  { %v407_v58 = vadd.f32 %v1415_v62, %v262_v43 }
 0x451   :  { %1192 = vmatpush3.bf16.msra.mxu1 %v1191_v28 }
 0x507   :  { %v686_v35 = vpop.f32.mrb[4].mxu1  ;;  %v757_v36 = vpop.f32.mrb[4].mxu0 }
 0x508   :  { %v687_v38 = vadd.f32 %v686_v35, %v608_v32  ;;  %v688_v39 = vpop.f32.mrb[5].mxu1  ;;  %v975_v40 = vpop.f32.mrb[5].mxu0  ;;  %v758_v60 = vadd.f32 %v757_v36, %v616_v56 }
 0x509   :  { %v689_v42 = vadd.f32 %v688_v39, %v612_v34 }
 0x50a   :  { %v761_v48 = vadd.f32 %v687_v38, %v336_v9 }
 0x50b   :  { %v768_v49 = vadd.f32 %v689_v42, %v405_v41 }
 0x50c   :  { %v888_v50 = vmul.f32 -1.442695, %v761_v48 }
 0x50d   :  { %v889_v51 = vmul.f32 -1.442695, %v768_v49 }
 0x50e   :  { %1225 = vpow2.f32 %v888_v50 }
 0x50f   :  { %1227 = vpow2.f32 %v889_v51 }
 0x518   :  { %v1226_v45 = vpop.eup %1225 }
 0x519   :  { %v765_v52 = vadd.f32 1.0, %v1226_v45  ;;  %v1228_v55 = vpop.eup %1227 }
 0x51a   :  { %v772_v57 = vadd.f32 1.0, %v1228_v55 }
 0x51b   :  { %1229 = vrcp.f32 %v765_v52 }
 0x51c   :  { %1231 = vrcp.f32 %v772_v57 }
 0x525   :  { %v1230_v59 = vpop.eup %1229 }
 0x526   :  { %v775_v61 = vmul.f32 %v1230_v59, %v407_v58  ;;  %v1232_v0 = vpop.eup %1231 }
 0x527   :  { %v778_v2 = vsub.f32 1.0, %v1232_v0  ;;  %v780_v5 = vmul.f32 %v1232_v0, %v1365_v37 }
 0x528   :  { %v776_v63 = vadd.f32 %v775_v61, %v758_v60 }
 0x52a   :  { %1233 = vtanh.f32 %v776_v63 }
 0x534   :  { %v1234_v3 = vpop.eup %1233 }
 0x535   :  { %v779_v4 = vmul.f32 %v1234_v3, %v778_v2 }
 0x537   :  { %v781_v44 = vadd.f32 %v780_v5, %v779_v4 }
 0x539   :  { %782 = vst [vmem:[#allocation2] sm:$0xff] %v781_v44  ;;  %1009 = vmatmul.mubr.f32.vlgmr.msra.gmra.mrb[6].mxu1 %v781_v44  ;;  %877 = vst [vmem:[%s1461_s5 + $0x8] sm:$0xff] %v781_v44 }
 0x60c   :  { %v872_v62 = vpop.f32.mrb[6].mxu1 }
 0x60d   :  { %v873_v6 = vadd.f32 %v890_v46, %v872_v62  ;;  %v1010_v7 = vpop.f32.mrb[7].mxu1 }
 0x60f   :  { %876 = vst [vmem:[%s1461_s5] sm:$0xff] %v873_v6 }
 0x610   :  { %883 = vsyncpa [#allocation4], 1 }
 0x611   :  { %884 = vsyncpa [#allocation6], 1 }

</bundles_post_ra>
